<compile_context>
chip_gen: v5e
topology: v5e:2x2
jax: 0.10.0
libtpu: 0.0.40
codegen_flags: <defaults>
</compile_context>

<pallas_src>
import functools

import jax
import jax.numpy as jnp
from jax import lax
from jax.experimental import pallas as pl
from jax.experimental.pallas import tpu as pltpu

IGNORE_INDEX = -100

_PER_BUFFER_VMEM_BUDGET = 6 * 1024 * 1024   # bytes of logits per pipeline buffer
_CHUNK_F32_BUDGET = 1 * 1024 * 1024         # target bytes of f32 intermediates / chunk
_MAX_TILE_ROWS = 1024
_VMEM_LIMIT_BYTES = 32 * 1024 * 1024        # raises v5e default, safe inside v7x 64 MiB
_NEG_INIT = jnp.finfo(jnp.float32).min      # finite -inf stand-in for the online max


def _ce_partial_kernel(logits_ref, labels_ref, out_ref, *, vocab_chunk):
    """One (batch, row-tile) grid step — emits partial (loss_sum, valid_count).

    logits_ref : (1, T, V)  input-dtype VMEM tile of *unshifted* logits rows
    labels_ref : (1, T, 1)  int32 shifted labels (pad / non-shift rows carry -100)
    out_ref    : (1, 1, 8, 128) f32 partials: [...,0,0]=sum(loss), [...,0,1]=count
    """
    labels = labels_ref[0]                              # (T, 1) int32
    t = logits_ref.shape[1]
    v = logits_ref.shape[2]

    vc = min(vocab_chunk, v)
    n_full = v // vc
    rem = v - n_full * vc

    # Online (chunked) logsumexp + one-hot label gather over the vocab axis.
    # All chunk starts/widths are static Python ints -> plain static VMEM slices.
    m = jnp.full((t, 1), _NEG_INIT, jnp.float32)        # running row max
    s = jnp.zeros((t, 1), jnp.float32)                  # running sum(exp(x - m))
    lbl = jnp.zeros((t, 1), jnp.float32)                # logit at the label index

    def update(m, s, lbl, start, width, x_chunk):
        x = x_chunk.astype(jnp.float32)                                  # (T, width)
        col = lax.broadcasted_iota(jnp.int32, (t, width), 1)             # (T, width)
        m_new = jnp.maximum(m, jnp.max(x, axis=-1, keepdims=True))       # (T, 1)
        s_new = s * jnp.exp(m - m_new) + jnp.sum(jnp.exp(x - m_new),
                                                 axis=-1, keepdims=True)
        lbl_new = lbl + jnp.sum(jnp.where(col == (labels - start), x, 0.0),
                                axis=-1, keepdims=True)
        return m_new, s_new, lbl_new

    for c in range(n_full):
        m, s, lbl = update(m, s, lbl, c * vc, vc,
                           logits_ref[0, :, pl.ds(c * vc, vc)])
    if rem:
        m, s, lbl = update(m, s, lbl, n_full * vc, rem,
                           logits_ref[0, :, pl.ds(n_full * vc, rem)])

    lse = m + jnp.log(s)                                                 # (T, 1)
    valid = labels != IGNORE_INDEX                                       # (T, 1)
    per_token = jnp.where(valid, lse - lbl, 0.0)                         # (T, 1)

    loss_sum = jnp.sum(per_token)                       # scalar f32
    valid_cnt = jnp.sum(valid.astype(jnp.float32))      # scalar f32

    sub = lax.broadcasted_iota(jnp.int32, (1, 1, 8, 128), 2)
    lane = lax.broadcasted_iota(jnp.int32, (1, 1, 8, 128), 3)
    out_ref[...] = jnp.where(
        (sub == 0) & (lane == 0), loss_sum,
        jnp.where((sub == 0) & (lane == 1), valid_cnt, 0.0))


def _round_down(x, m):
    return (x // m) * m


def _round_up(x, m):
    return -(-x // m) * m


def _choose_tiling(S, V, itemsize, max_tile_rows, vocab_chunk):
    """Row tile, #tiles and in-kernel vocab chunk (all static ints)."""
    rows = S - 1
    # sublane packing: f32 -> 8 rows, bf16 -> 16, int8/fp8 -> 32
    row_align = 8 * max(1, 4 // itemsize)
    budget_rows = _PER_BUFFER_VMEM_BUDGET // (itemsize * V)
    budget_rows = max(row_align, _round_down(budget_rows, row_align))
    budget_rows = min(budget_rows, _MAX_TILE_ROWS)
    if max_tile_rows is not None:
        budget_rows = min(budget_rows,
                          max(row_align, _round_down(max_tile_rows, row_align)))
    if budget_rows >= rows:
        tile, n_tiles = S, 1                 # one block spans the whole sequence
    else:
        tile, n_tiles = budget_rows, pl.cdiv(rows, budget_rows)

    if vocab_chunk is None:
        chunk = max(128, _round_down(_CHUNK_F32_BUDGET // (4 * tile), 128))
    else:
        chunk = max(128, _round_up(int(vocab_chunk), 128))
    chunk = min(chunk, V)
    return tile, n_tiles, chunk


@functools.partial(jax.jit, static_argnames=("max_tile_rows", "vocab_chunk"))
def loss_pipe_layer(logits, labels, *, max_tile_rows=None, vocab_chunk=None):
    """logits: (B, S, V) float (f32 or bf16); labels: (B, S) int. Scalar f32 loss."""
    B, S, V = logits.shape
    assert S >= 2, "need at least 2 tokens for a shifted LM loss"
    rows = S - 1
    itemsize = jnp.dtype(logits.dtype).itemsize
    tile, n_tiles, chunk = _choose_tiling(S, V, itemsize, max_tile_rows, vocab_chunk)
    l_pad = n_tiles * tile

    # Only the tiny label tensor is shifted/padded in JAX (4*B*S bytes).
    # Rows >= S-1 (incl. the ragged tail of the last logits block) get -100,
    # which masks them out in-kernel — the logits themselves are untouched.
    shift_labels = labels[:, 1:].astype(jnp.int32)                       # (B, S-1)
    pad = l_pad - rows
    if pad:
        shift_labels = jnp.pad(shift_labels, ((0, 0), (0, pad)),
                               constant_values=IGNORE_INDEX)
    shift_labels = shift_labels.reshape(B, l_pad, 1)

    kernel = functools.partial(_ce_partial_kernel, vocab_chunk=chunk)

    partials = pl.pallas_call(
        kernel,
        out_shape=jax.ShapeDtypeStruct((B, n_tiles, 8, 128), jnp.float32),
        grid_spec=pltpu.PrefetchScalarGridSpec(
            num_scalar_prefetch=0,
            grid=(B, n_tiles),
            in_specs=[
                pl.BlockSpec((1, tile, V), lambda b, i: (b, i, 0)),   # raw logits
                pl.BlockSpec((1, tile, 1), lambda b, i: (b, i, 0)),   # shifted labels
            ],
            out_specs=pl.BlockSpec((1, 1, 8, 128), lambda b, i: (b, i, 0, 0)),
        ),
        compiler_params=pltpu.CompilerParams(
            dimension_semantics=("parallel", "parallel"),
            vmem_limit_bytes=_VMEM_LIMIT_BYTES,
        ),
    )(logits, shift_labels)

    loss_sum = jnp.sum(partials[:, :, 0, 0])
    valid_cnt = jnp.sum(partials[:, :, 0, 1])
    # Matches PyTorch: if every token is ignored this yields NaN (0/0).
    return loss_sum / valid_cnt


def _reference_loss(logits, labels):
    """Pure-JAX reference of the PyTorch forward (for verification)."""
    B, S, V = logits.shape
    sl = logits[:, :-1, :].reshape(-1, V).astype(jnp.float32)
    lb = labels[:, 1:].reshape(-1)
    lse = jax.scipy.special.logsumexp(sl, axis=-1)
    safe_lb = jnp.where(lb == IGNORE_INDEX, 0, lb)
    picked = jnp.take_along_axis(sl, safe_lb[:, None], axis=-1)[:, 0]
    valid = lb != IGNORE_INDEX
    per_tok = jnp.where(valid, lse - picked, 0.0)
    return jnp.sum(per_tok) / jnp.sum(valid.astype(jnp.float32))


if __name__ == "__main__":
    key = jax.random.PRNGKey(0)
    k_logits, k_labels, k_mask = jax.random.split(key, 3)

    # Test 1: small shapes consistent with the module (single row tile, single chunk).
    B, S, V = 2, 8, 128
    logits = jax.random.normal(k_logits, (B, S, V), dtype=jnp.float32)
    labels = jax.random.randint(k_labels, (B, S), 0, V, dtype=jnp.int32)
    ignore_mask = jax.random.bernoulli(k_mask, 0.25, (B, S))
    labels = jnp.where(ignore_mask, IGNORE_INDEX, labels)

    loss = jax.block_until_ready(loss_pipe_layer(logits, labels))
    ref = _reference_loss(logits, labels)
    assert jnp.allclose(loss, ref, rtol=1e-5, atol=1e-5), (loss, ref)

    # Test 2: multi-tile path with a ragged tail (S-1 not divisible by the tile),
    # exercising the edge-block masking via the -100 padded labels.
    B2, S2, V2 = 2, 21, 128
    k1, k2, k3 = jax.random.split(jax.random.PRNGKey(1), 3)
    logits2 = jax.random.normal(k1, (B2, S2, V2), dtype=jnp.float32)
    labels2 = jax.random.randint(k2, (B2, S2), 0, V2, dtype=jnp.int32)
    labels2 = jnp.where(jax.random.bernoulli(k3, 0.25, (B2, S2)),
                        IGNORE_INDEX, labels2)
    loss2 = jax.block_until_ready(loss_pipe_layer(logits2, labels2, max_tile_rows=8))
    ref2 = _reference_loss(logits2, labels2)
    assert jnp.allclose(loss2, ref2, rtol=1e-5, atol=1e-5), (loss2, ref2)

    # Test 3: bf16 logits stay narrow in HBM; up-cast happens inside the kernel.
    logits_bf16 = logits.astype(jnp.bfloat16)
    loss3 = jax.block_until_ready(loss_pipe_layer(logits_bf16, labels))
    ref3 = _reference_loss(logits_bf16.astype(jnp.float32), labels)
    assert jnp.allclose(loss3, ref3, rtol=1e-4, atol=1e-4), (loss3, ref3)

    # Test 4: force the in-kernel vocab-chunked online-logsumexp path, including a
    # ragged (non-128) vocab tail — the large-vocab (ChatGLM ~130K) code path.
    B4, S4, V4 = 2, 16, 400
    k4a, k4b, k4c = jax.random.split(jax.random.PRNGKey(2), 3)
    logits4 = jax.random.normal(k4a, (B4, S4, V4), dtype=jnp.float32)
    labels4 = jax.random.randint(k4b, (B4, S4), 0, V4, dtype=jnp.int32)
    labels4 = jnp.where(jax.random.bernoulli(k4c, 0.25, (B4, S4)),
                        IGNORE_INDEX, labels4)
    loss4 = jax.block_until_ready(loss_pipe_layer(logits4, labels4, vocab_chunk=128))
    ref4 = _reference_loss(logits4, labels4)
    assert jnp.allclose(loss4, ref4, rtol=1e-5, atol=1e-5), (loss4, ref4)

    print("KERNEL_OK")
</pallas_src>

<mosaic_0001>
module attributes {stable_mosaic.version = 11 : i64} {
  func.func @_ce_partial_kernel(%arg0: i32, %arg1: i32, %arg2: memref<1x8x128xf32, #tpu.memory_space<vmem>>, %arg3: memref<1x8x1xi32, #tpu.memory_space<vmem>>, %arg4: memref<1x1x8x128xf32, #tpu.memory_space<vmem>>) attributes {dimension_semantics = [#tpu.dimension_semantics<parallel>, #tpu.dimension_semantics<parallel>], iteration_bounds = array<i64: 2, 1>, scalar_prefetch = 0 : i64, scratch_operands = 0 : i64, tpu.core_type = #tpu.core_type<tc>, window_params = [{transform_indices = @transform_0, window_bounds = array<i64: 1, 8, 128>}, {transform_indices = @transform_1, window_bounds = array<i64: 1, 8, 1>}, {transform_indices = @transform_2, window_bounds = array<i64: 1, 1, 8, 128>}]} {
    %c0 = arith.constant 0 : index
    %c0_0 = arith.constant 0 : index
    %c0_1 = arith.constant 0 : index
    %0 = vector.load %arg3[%c0, %c0_0, %c0_1] : memref<1x8x1xi32, #tpu.memory_space<vmem>>, vector<1x8x1xi32>
    %1 = vector.shape_cast %0 : vector<1x8x1xi32> to vector<8x1xi32>
    %cst = arith.constant -3.40282347E+38 : f32
    %2 = vector.broadcast %cst : f32 to vector<8x1xf32>
    %cst_2 = arith.constant 0.000000e+00 : f32
    %3 = vector.broadcast %cst_2 : f32 to vector<8x1xf32>
    %cst_3 = arith.constant 0.000000e+00 : f32
    %4 = vector.broadcast %cst_3 : f32 to vector<8x1xf32>
    %c0_4 = arith.constant 0 : index
    %c0_5 = arith.constant 0 : index
    %c0_6 = arith.constant 0 : index
    %5 = vector.load %arg2[%c0_4, %c0_5, %c0_6] : memref<1x8x128xf32, #tpu.memory_space<vmem>>, vector<1x8x128xf32>
    %6 = vector.shape_cast %5 : vector<1x8x128xf32> to vector<8x128xf32>
    %7 = tpu.iota {dimensions = array<i32: 1>} : vector<8x128xi32>
    %cst_7 = arith.constant dense<0xFF800000> : vector<8xf32>
    %8 = vector.multi_reduction <maximumf>, %6, %cst_7 [1] : vector<8x128xf32> to vector<8xf32>
    %9 = vector.shape_cast %8 : vector<8xf32> to vector<8x1xf32>
    %10 = arith.maximumf %2, %9 : vector<8x1xf32>
    %11 = arith.subf %2, %10 : vector<8x1xf32>
    %12 = math.exp %11 : vector<8x1xf32>
    %13 = arith.mulf %3, %12 : vector<8x1xf32>
    %14 = vector.broadcast %10 : vector<8x1xf32> to vector<8x128xf32>
    %15 = arith.subf %6, %14 : vector<8x128xf32>
    %16 = math.exp %15 : vector<8x128xf32>
    %cst_8 = arith.constant dense<0.000000e+00> : vector<8xf32>
    %17 = vector.multi_reduction <add>, %16, %cst_8 [1] : vector<8x128xf32> to vector<8xf32>
    %18 = vector.shape_cast %17 : vector<8xf32> to vector<8x1xf32>
    %19 = arith.addf %13, %18 : vector<8x1xf32>
    %c0_i32 = arith.constant 0 : i32
    %20 = vector.broadcast %c0_i32 : i32 to vector<8x1xi32>
    %21 = arith.subi %1, %20 : vector<8x1xi32>
    %22 = vector.broadcast %21 : vector<8x1xi32> to vector<8x128xi32>
    %23 = arith.cmpi eq, %7, %22 : vector<8x128xi32>
    %cst_9 = arith.constant 0.000000e+00 : f32
    %24 = vector.broadcast %cst_9 : f32 to vector<8x128xf32>
    %25 = arith.select %23, %6, %24 : vector<8x128xi1>, vector<8x128xf32>
    %cst_10 = arith.constant dense<0.000000e+00> : vector<8xf32>
    %26 = vector.multi_reduction <add>, %25, %cst_10 [1] : vector<8x128xf32> to vector<8xf32>
    %27 = vector.shape_cast %26 : vector<8xf32> to vector<8x1xf32>
    %28 = arith.addf %4, %27 : vector<8x1xf32>
    %29 = math.log %19 : vector<8x1xf32>
    %30 = arith.addf %10, %29 : vector<8x1xf32>
    %c-100_i32 = arith.constant -100 : i32
    %31 = vector.broadcast %c-100_i32 : i32 to vector<8x1xi32>
    %32 = arith.cmpi ne, %1, %31 : vector<8x1xi32>
    %33 = arith.subf %30, %28 : vector<8x1xf32>
    %cst_11 = arith.constant 0.000000e+00 : f32
    %34 = vector.broadcast %cst_11 : f32 to vector<8x1xf32>
    %35 = arith.select %32, %33, %34 : vector<8x1xi1>, vector<8x1xf32>
    %36 = vector.shape_cast %35 : vector<8x1xf32> to vector<1x8x1xf32>
    %cst_12 = arith.constant dense<0.000000e+00> : vector<1xf32>
    %37 = vector.multi_reduction <add>, %36, %cst_12 [1, 2] : vector<1x8x1xf32> to vector<1xf32>
    %38 = vector.shape_cast %37 : vector<1xf32> to vector<1x1x1xf32>
    %39 = vector.extract %38[0, 0, 0] : f32 from vector<1x1x1xf32>
    %40 = arith.extui %32 : vector<8x1xi1> to vector<8x1xi32>
    %41 = arith.sitofp %40 : vector<8x1xi32> to vector<8x1xf32>
    %42 = vector.shape_cast %41 : vector<8x1xf32> to vector<1x8x1xf32>
    %cst_13 = arith.constant dense<0.000000e+00> : vector<1xf32>
    %43 = vector.multi_reduction <add>, %42, %cst_13 [1, 2] : vector<1x8x1xf32> to vector<1xf32>
    %44 = vector.shape_cast %43 : vector<1xf32> to vector<1x1x1xf32>
    %45 = vector.extract %44[0, 0, 0] : f32 from vector<1x1x1xf32>
    %46 = tpu.iota {dimensions = array<i32: 2>} : vector<1x1x8x128xi32>
    %47 = tpu.iota {dimensions = array<i32: 3>} : vector<1x1x8x128xi32>
    %c0_i32_14 = arith.constant 0 : i32
    %48 = vector.broadcast %c0_i32_14 : i32 to vector<1x1x8x128xi32>
    %49 = arith.cmpi eq, %46, %48 : vector<1x1x8x128xi32>
    %c0_i32_15 = arith.constant 0 : i32
    %50 = vector.broadcast %c0_i32_15 : i32 to vector<1x1x8x128xi32>
    %51 = arith.cmpi eq, %47, %50 : vector<1x1x8x128xi32>
    %52 = arith.andi %49, %51 : vector<1x1x8x128xi1>
    %c0_i32_16 = arith.constant 0 : i32
    %53 = vector.broadcast %c0_i32_16 : i32 to vector<1x1x8x128xi32>
    %54 = arith.cmpi eq, %46, %53 : vector<1x1x8x128xi32>
    %c1_i32 = arith.constant 1 : i32
    %55 = vector.broadcast %c1_i32 : i32 to vector<1x1x8x128xi32>
    %56 = arith.cmpi eq, %47, %55 : vector<1x1x8x128xi32>
    %57 = arith.andi %54, %56 : vector<1x1x8x128xi1>
    %cst_17 = arith.constant 0.000000e+00 : f32
    %58 = vector.broadcast %45 : f32 to vector<1x1x8x128xf32>
    %59 = vector.broadcast %cst_17 : f32 to vector<1x1x8x128xf32>
    %60 = arith.select %57, %58, %59 : vector<1x1x8x128xi1>, vector<1x1x8x128xf32>
    %61 = vector.broadcast %39 : f32 to vector<1x1x8x128xf32>
    %62 = arith.select %52, %61, %60 : vector<1x1x8x128xi1>, vector<1x1x8x128xf32>
    %c0_18 = arith.constant 0 : index
    %c0_19 = arith.constant 0 : index
    %c0_20 = arith.constant 0 : index
    %c0_21 = arith.constant 0 : index
    %63 = vector.load %arg4[%c0_18, %c0_19, %c0_20, %c0_21] : memref<1x1x8x128xf32, #tpu.memory_space<vmem>>, vector<1x1x8x128xf32>
    tpu.vector_store %arg4[%c0_18, %c0_19, %c0_20, %c0_21], %62 {strides = array<i32>} : memref<1x1x8x128xf32, #tpu.memory_space<vmem>>, vector<1x1x8x128xf32>,
    return
  }
  func.func @transform_0(%arg0: i32, %arg1: i32) -> (i32, i32, i32) {
    %c0_i32 = arith.constant 0 : i32
    %c0_i32_0 = arith.constant 0 : i32
    return %arg0, %arg1, %c0_i32 : i32, i32, i32
  }
  func.func @transform_1(%arg0: i32, %arg1: i32) -> (i32, i32, i32) {
    %c0_i32 = arith.constant 0 : i32
    %c0_i32_0 = arith.constant 0 : i32
    return %arg0, %arg1, %c0_i32 : i32, i32, i32
  }
  func.func @transform_2(%arg0: i32, %arg1: i32) -> (i32, i32, i32, i32) {
    %c0_i32 = arith.constant 0 : i32
    %c0_i32_0 = arith.constant 0 : i32
    %c0_i32_1 = arith.constant 0 : i32
    return %arg0, %arg1, %c0_i32, %c0_i32_0 : i32, i32, i32, i32
  }
}

</mosaic_0001>

<bundles_post_ra>
// kernel: loss_pipe_layer.1
= control target key start
LH: loop header
LB: loop body
LE: loop exit
PB: predicated region body
PF: predicated region fallthrough
CT: control target
= control target key end

     0   :  { %s442_s9 = smov 0   ;;  %s444_s10 = smov 0   ;;  %s483_s0 = inlined_call_operand.vmem [shape: f32[2,8,128], index: 0, kind: input, shape index: {}]   ;;  %s484_s1 = inlined_call_operand.vmem [shape: s32[2,8,1], index: 1, kind: input, shape index: {}]   ;;  %s485_s2 = inlined_call_operand.vmem [shape: f32[2,1,8,128], index: 2, kind: output, shape index: {}]  }
   0x1   :  { %s446_s11 = smov 0  }
   0x2 LB: > { %s24_s12 = sadd.s32 1, %s419_s10  ;;  %p357_p0 = scmp.ge.s32.totalorder %s423_s11, 1  ;;  %s423_s11 = sphi %s446_s11, %s12_s11   ;;  %s419_s10 = sphi %s444_s10, %s487_s10   ;;  %s415_s9 = sphi %s442_s9, %s486_s9  }
   0x3   : > { %p26_p1 = scmp.ge.s32.totalorder %s24_s12, 2  ;;  %p144_p2 = scmp.lt.s32.totalorder %s423_s11, 3 }
   0x5   : > { %s489_s12 = smov (%p26_p1, %s24_s12), 0  ;;  %p145_p3 = pnand %p357_p0, %p144_p2 }
   0x6   : > { %p177_p4 = scmp.lt.s32.totalorder (!%p145_p3), %s415_s9, 1 }
   0x7   : > { %148 = sbr.rel (%p145_p3) target bundleno = 468 (0x1d4), region = 28 }
   0xc   : > { %v425_v0 = vmov 0   ;;  %s491_s9 = smov (!%p177_p4, %s415_s9), 1  ;;  %v200_v7 = vlaneseq  ;;  %vm229_vm2 = vcmask 7168   ;;  %v426_v25 = vmov 0.0  }
   0xd   : > { %394 = vset.pattern.permute.xlu0 %v425_v0  ;;  %s460_s13 = sshll.u32 %s491_s9, 3 }
   0xe   : > { %s183_s16 = scalar_lea.vmem %s483_s0, %s460_s13  ;;  %s190_s19 = scalar_lea.vmem %s484_s1, %s460_s13  ;;  %v201_v9 = vand.u32 127, %v200_v7  ;;  %v253_v42 = vshrl.u32 %v200_v7, 7 }
   0xf   : > { %v199_v1 = vld [vmem:[%s183_s16] sm:$0xff]  ;;  %s197_s24 = scalar_lea.vmem %s485_s2, %s460_s13 }
  0x10   : > { %202 = vmax.xlane.f32.xlu0 %v199_v1  ;;  %v198_v2 = vld [vmem:[%s190_s19] sm:$0xff]  ;;  %vm254_vm3 = vcmp.eq.s32.totalorder %v253_v42, 0  ;;  %vm257_vm4 = vcmp.eq.s32.totalorder %v201_v9, 1  ;;  %vm255_vm5 = vcmp.eq.s32.totalorder %v201_v9, 0 }
  0x11   : > { %vm226_vm1 = vcmp.ne.s32.totalorder %v198_v2, 4294967196  ;;  %vm258_vm6 = vmand %vm254_vm3, %vm257_vm4 }
  0x12   : > { %v361_v26 = vsel %vm226_vm1, 1.0, %v426_v25  ;;  %vm256_vm7 = vmand %vm254_vm3, %vm255_vm5 }
  0x13   : > { %v242_v27 = vsel %vm229_vm2, %v361_v26, 0.0 }
  0x24   : > { %216 = vperm.xlu0 %394, %v198_v2  }
  0x83   : > { %v203_v3 = vpop.xlane.xlu0 %202 }
  0x84   : > { %v204_v4 = vmax.f32 %v203_v3, -3.4028235e+38 }
  0x86   : > { %v209_v5 = vsub.f32 %v199_v1, %v204_v4  ;;  %v205_v12 = vsub.f32 -3.4028235e+38, %v204_v4 }
  0x88   : > { %v210_v6 = vmul.f32 1.442695, %v209_v5  ;;  %v206_v13 = vmul.f32 1.442695, %v205_v12 }
  0x8a   : > { %395 = vpow2.f32 %v210_v6 }
  0x8b   : > { %397 = vpow2.f32 %v206_v13 }
  0x90   : > { %v396_v8 = vpop.eup %395 }
  0x91   : > { %212 = vadd.xlane.f32.xlu1 %v396_v8  ;;  %v398_v14 = vpop.eup %397 }
  0x92   : > { %v208_v15 = vmul.f32 0.0, %v398_v14 }
  0x96   : > { %v217_v10 = vpop.permute.xlu0 %216 }
  0x97   : > { %vm218_vm0 = vcmp.eq.s32.totalorder %v201_v9, %v217_v10 }
  0x98   : > { %v219_v11 = vsel %vm218_vm0, %v199_v1, 0.0 }
  0x99   : > { %220 = vadd.xlane.f32.xlu1 %v219_v11 }
 0x104   : > { %v213_v16 = vpop.xlane.xlu1 %212 }
 0x105   : > { %v214_v17 = vadd.f32 %v213_v16, %v208_v15 }
 0x107   : > { %399 = vlog2.f32 %v214_v17 }
 0x10c   : > { %v221_v20 = vpop.xlane.xlu1 %220 }
 0x10d   : > { %v400_v18 = vpop.eup %399 }
 0x10e   : > { %v224_v19 = vmul.f32 0.6931472, %v400_v18 }
 0x110   : > { %v225_v21 = vadd.f32 %v224_v19, %v204_v4 }
 0x112   : > { %v227_v22 = vsub.f32 %v225_v21, %v221_v20 }
 0x114   : > { %v228_v23 = vsel %vm226_vm1, %v227_v22, 0.0 }
 0x115   : > { %v230_v24 = vsel %vm229_vm2, %v228_v23, 0.0 }
 0x116   : > { %231 = vadd.xlane.f32.xlu2 %v230_v24 }
 0x11e   : > { %243 = vadd.xlane.f32.xlu2 %v242_v27 }
 0x189   : > { %v232_v28 = vpop.xlane.xlu2 %231 }
 0x18a   : > { %v233_v29 = vrot.slane %v232_v28, 4 }
 0x18c   : > { %v234_v30 = vadd.f32 %v233_v29, %v232_v28 }
 0x18e   : > { %v235_v31 = vrot.slane %v234_v30, 2 }
 0x190   : > { %v236_v32 = vadd.f32 %v235_v31, %v234_v30 }
 0x191   : > { %v244_v33 = vpop.xlane.xlu2 %243 }
 0x192   : > { %v245_v34 = vrot.slane %v244_v33, 4  ;;  %v237_v35 = vrot.slane %v236_v32, 1 }
 0x194   : > { %v246_v36 = vadd.f32 %v245_v34, %v244_v33  ;;  %v238_v37 = vadd.f32 %v237_v35, %v236_v32 }
 0x196   : > { %v247_v38 = vrot.slane %v246_v36, 2  ;;  %364 = vpush %v238_v37 }
 0x198   : > { %v248_v39 = vadd.f32 %v247_v38, %v246_v36 }
 0x19a   : > { %v249_v40 = vrot.slane %v248_v39, 1 }
 0x19c   : > { %v250_v41 = vadd.f32 %v249_v40, %v248_v39 }
 0x19e   : > { %366 = vpush %v250_v41 }
 0x1c7   : > { %s365_s20 = spop %364 }
 0x1c8   : > { %v261_v44 = vstv %s365_s20 }
 0x1cf   : > { %s367_s21 = spop %366 }
 0x1d0   : > { %v259_v43 = vstv %s367_s21 }
 0x1d1   : > { %v260_v45 = vsel %vm258_vm6, %v259_v43, 0.0 }
 0x1d2   : > { %v262_v46 = vsel %vm256_vm7, %v261_v44, %v260_v45 }
 0x1d3   : > { %263 = vst [vmem:[%s197_s24] sm:$0xff] %v262_v46 }
 0x1d4 PF: > { %s12_s11 = sadd.s32 1, %s423_s11   ;;  %s486_s9 = smov %s419_s10 }
 0x1d5   : > { %p9_p5 = scmp.ge.s32.totalorder %s12_s11, 4   ;;  %s487_s10 = smov %s489_s12 }
 0x1d7   :  { %11 = sbr.rel (!%p9_p5) target bundleno = 2 (0x2), region = 61 }

</bundles_post_ra>
